<compile_context>
chip_gen: v5e
topology: v5e:2x2
jax: 0.10.0
libtpu: 0.0.40
codegen_flags: <defaults>
</compile_context>

<pallas_src>
import functools
import math

import jax
import jax.numpy as jnp
from jax.experimental import pallas as pl
from jax.experimental.pallas import tpu as pltpu


def _round_up(a: int, b: int) -> int:
    return (a + b - 1) // b * b


def _choose_group(num_heads: int, head_dim: int, target: int = 128) -> int:
    """Smallest divisor G of num_heads with G*head_dim >= target, else all heads."""
    for d in range(1, num_heads + 1):
        if num_heads % d == 0 and d * head_dim >= target:
            return d
    return num_heads


def _nbytes(a) -> int:
    return math.prod(a.shape) * jnp.dtype(a.dtype).itemsize


def attention_kernel(x_ref, wqkv_ref, bqkv_ref, wp_ref, bp_ref, o_ref, *,
                     heads_per_group, head_dim, weights_resident):
    hg = pl.program_id(1)
    G, hd = heads_per_group, head_dim
    Gw = G * hd
    w_idx = hg if weights_resident else 0

    x = x_ref[0]                                              # (N, Cp) bf16

    # Packed q|k|v projection for this head group: one wide MXU matmul.
    # Softmax scale is already folded into the q columns / bias.
    qkv = jnp.dot(x, wqkv_ref[w_idx],
                  preferred_element_type=jnp.float32) + bqkv_ref[w_idx]

    head_outs = []
    for g in range(G):                                        # static unroll
        q = qkv[:, g * hd:(g + 1) * hd]
        k = qkv[:, Gw + g * hd:Gw + (g + 1) * hd]
        v = qkv[:, 2 * Gw + g * hd:2 * Gw + (g + 1) * hd]

        s = jax.lax.dot_general(
            q.astype(jnp.bfloat16), k.astype(jnp.bfloat16),
            dimension_numbers=(((1,), (1,)), ((), ())),
            preferred_element_type=jnp.float32)               # (N, N)

        s = s - jnp.max(s, axis=-1, keepdims=True)
        p = jnp.exp(s)
        p = p * pl.reciprocal(jnp.sum(p, axis=-1, keepdims=True), approx=True)

        head_outs.append(
            jnp.dot(p.astype(jnp.bfloat16), v.astype(jnp.bfloat16),
                    preferred_element_type=jnp.float32).astype(jnp.bfloat16))

    group_out = head_outs[0] if G == 1 else jnp.concatenate(head_outs, axis=-1)

    # Output projection for this group's slice of the concat-head dim:
    # contraction width Gw (>=128 whenever the model allows), one f32
    # read-modify-write of the resident output block per group.
    contrib = jnp.dot(group_out, wp_ref[w_idx],
                      preferred_element_type=jnp.float32)     # (N, Cp)

    @pl.when(hg == 0)
    def _init():
        o_ref[0] = jnp.broadcast_to(bp_ref[...], contrib.shape)

    o_ref[0] += contrib


def attention_pallas(x, params, num_heads):
    B, N, C = x.shape
    H = num_heads
    assert C % H == 0, "dim must be divisible by num_heads"
    hd = C // H
    scale = hd ** (-0.5)

    G = _choose_group(H, hd)          # heads per grid step
    HG = H // G                       # number of head groups (inner grid axis)
    Gw = G * hd                       # group width in the concat-head dim
    Cp = _round_up(C, 128)            # lane-dense x / output / projection width

    f32, bf16 = jnp.float32, jnp.bfloat16

    qkv_w = params["qkv_w"].astype(f32)     # (C, 3C) == torch qkv.weight.T
    qkv_b = params["qkv_b"].astype(f32)     # (3C,)
    proj_w = params["proj_w"].astype(f32)   # (C, C)  == torch proj.weight.T
    proj_b = params["proj_b"].astype(f32)   # (C,)

    # Split qkv, fold the softmax scale into Wq / bq.
    wq = qkv_w[:, :C] * scale
    wk = qkv_w[:, C:2 * C]
    wv = qkv_w[:, 2 * C:]
    bq = qkv_b[:C] * scale
    bk = qkv_b[C:2 * C]
    bv = qkv_b[2 * C:]

    def group_w(w):                         # (C, C) -> (HG, C, Gw)
        w = w.reshape(C, H, hd).transpose(1, 0, 2)            # (H, C, hd)
        w = w.reshape(HG, G, C, hd).transpose(0, 2, 1, 3)     # (HG, C, G, hd)
        return w.reshape(HG, C, Gw)

    def group_b(b):                         # (C,) -> (HG, Gw)
        return b.reshape(HG, Gw)

    # Packed per-group QKV weights: lane layout [q_group | k_group | v_group].
    wqkv = jnp.concatenate([group_w(wq), group_w(wk), group_w(wv)], axis=-1)
    wqkv = jnp.pad(wqkv, ((0, 0), (0, Cp - C), (0, 0))).astype(bf16)   # (HG, Cp, 3Gw)
    bqkv = jnp.concatenate([group_b(bq), group_b(bk), group_b(bv)], axis=-1)
    bqkv = bqkv[:, None, :].astype(f32)                                # (HG, 1, 3Gw)

    # Output projection, viewed per group of the concat-head input dim.
    wp = proj_w.reshape(HG, Gw, C)
    wp = jnp.pad(wp, ((0, 0), (0, 0), (0, Cp - C))).astype(bf16)       # (HG, Gw, Cp)
    bp = jnp.pad(proj_b, (0, Cp - C)).astype(f32)[None, :]             # (1, Cp)

    # x: bf16 + zero-padded lanes (padding is mathematically exact).
    x_p = jnp.pad(x, ((0, 0), (0, 0), (0, Cp - C))).astype(bf16)       # (B, N, Cp)

    weight_bytes = _nbytes(wqkv) + _nbytes(bqkv) + _nbytes(wp) + _nbytes(bp)
    # Keep all per-group weights VMEM-resident (DMA'd once for the whole grid)
    # when they fit comfortably; otherwise stream one head group per step.
    weights_resident = weight_bytes <= 20 * 1024 * 1024

    if weights_resident:
        wqkv_spec = pl.BlockSpec((HG, Cp, 3 * Gw), lambda b, hg: (0, 0, 0))
        bqkv_spec = pl.BlockSpec((HG, 1, 3 * Gw), lambda b, hg: (0, 0, 0))
        wp_spec = pl.BlockSpec((HG, Gw, Cp), lambda b, hg: (0, 0, 0))
    else:
        wqkv_spec = pl.BlockSpec((1, Cp, 3 * Gw), lambda b, hg: (hg, 0, 0))
        bqkv_spec = pl.BlockSpec((1, 1, 3 * Gw), lambda b, hg: (hg, 0, 0))
        wp_spec = pl.BlockSpec((1, Gw, Cp), lambda b, hg: (hg, 0, 0))

    in_specs = [
        pl.BlockSpec((1, N, Cp), lambda b, hg: (b, 0, 0)),     # x (bf16)
        wqkv_spec,
        bqkv_spec,
        wp_spec,
        pl.BlockSpec((1, Cp), lambda b, hg: (0, 0)),           # proj bias
    ]
    out_spec = pl.BlockSpec((1, N, Cp), lambda b, hg: (b, 0, 0))

    # VMEM budget from the actual buffer footprint (double-buffered pipelined
    # blocks + weights + intermediates), clamped to the chip's capacity.
    if weights_resident:
        w_vmem = 2 * weight_bytes
    else:
        w_vmem = 2 * (Cp * 3 * Gw * 2 + 3 * Gw * 4 + Gw * Cp * 2) + Cp * 4
    interm = N * 3 * Gw * 4 + 2 * N * N * 4 + 2 * N * Cp * 4 + N * Gw * 2
    footprint = 2 * N * Cp * 2 + 2 * N * Cp * 4 + w_vmem + interm
    try:
        vmem_cap = int(pltpu.get_tpu_info().vmem_capacity_bytes)
    except Exception:
        vmem_cap = 64 * 1024 * 1024            # v7x-safe fallback
    vmem_limit = max(32 * 1024 * 1024, int(1.5 * footprint) + (4 << 20))
    vmem_limit = min(vmem_limit, max(32 * 1024 * 1024, vmem_cap - (4 << 20)))

    flops = B * (2 * N * Cp * 3 * C + 4 * N * N * C + 2 * N * C * Cp)
    transcendentals = B * H * N * N
    bytes_accessed = (B * N * Cp * 2 + B * N * Cp * 4
                      + weight_bytes * (1 if weights_resident else B))

    kernel = functools.partial(
        attention_kernel,
        heads_per_group=G, head_dim=hd, weights_resident=weights_resident)

    out_p = pl.pallas_call(
        kernel,
        out_shape=jax.ShapeDtypeStruct((B, N, Cp), f32),
        grid_spec=pltpu.PrefetchScalarGridSpec(
            num_scalar_prefetch=0,
            grid=(B, HG),
            in_specs=in_specs,
            out_specs=out_spec,
        ),
        compiler_params=pltpu.CompilerParams(
            dimension_semantics=("parallel", "arbitrary"),
            vmem_limit_bytes=int(vmem_limit),
        ),
        cost_estimate=pl.CostEstimate(
            flops=int(flops),
            transcendentals=int(transcendentals),
            bytes_accessed=int(bytes_accessed),
        ),
    )(x_p, wqkv, bqkv, wp, bp)

    return out_p[:, :, :C]


def reference_attention(x, params, num_heads):
    """Pure-JAX (f32) reference mirroring the PyTorch forward exactly."""
    B, N, C = x.shape
    hd = C // num_heads
    scale = hd ** (-0.5)
    qkv = x @ params["qkv_w"] + params["qkv_b"]
    qkv = qkv.reshape(B, N, 3, num_heads, hd).transpose(2, 0, 3, 1, 4)
    q, k, v = qkv[0], qkv[1], qkv[2]                 # (B, H, N, hd)
    attn = jnp.einsum("bhnd,bhmd->bhnm", q, k) * scale
    attn = jax.nn.softmax(attn, axis=-1)
    out = jnp.einsum("bhnm,bhmd->bhnd", attn, v)
    out = out.transpose(0, 2, 1, 3).reshape(B, N, C)
    return out @ params["proj_w"] + params["proj_b"]


if __name__ == "__main__":
    B, N, C = 2, 8, 32
    num_heads = 4

    key = jax.random.PRNGKey(0)
    ks = jax.random.split(key, 5)

    def init(k, shape, s=0.1):
        return (s * jax.random.normal(k, shape)).astype(jnp.float32)

    # Weights stored as (in, out) = transpose of torch.nn.Linear.weight.
    # (qkv_bias=True variant; for qkv_bias=False pass zeros for qkv_b.)
    params = dict(
        qkv_w=init(ks[0], (C, 3 * C)),
        qkv_b=init(ks[1], (3 * C,)),
        proj_w=init(ks[2], (C, C)),
        proj_b=init(ks[3], (C,)),
    )
    x = jax.random.normal(ks[4], (B, N, C), dtype=jnp.float32)

    out = attention_pallas(x, params, num_heads)
    out = jax.block_until_ready(out)

    ref = reference_attention(x, params, num_heads)
    assert out.shape == (B, N, C)
    max_err = float(jnp.max(jnp.abs(out - ref)))
    # bf16 matmuls + approx reciprocal -> ~1e-2 tolerance vs f32 reference.
    assert jnp.allclose(out, ref, atol=2e-2, rtol=2e-2), max_err

    print("KERNEL_OK")
</pallas_src>

<mosaic_0001>
module attributes {stable_mosaic.version = 11 : i64} {
  func.func @attention_kernel(%arg0: i32, %arg1: i32, %arg2: memref<1x8x128xbf16, #tpu.memory_space<vmem>>, %arg3: memref<1x128x96xbf16, #tpu.memory_space<vmem>>, %arg4: memref<1x1x96xf32, #tpu.memory_space<vmem>>, %arg5: memref<1x32x128xbf16, #tpu.memory_space<vmem>>, %arg6: memref<1x128xf32, #tpu.memory_space<vmem>>, %arg7: memref<1x8x128xf32, #tpu.memory_space<vmem>>) attributes {dimension_semantics = [#tpu.dimension_semantics<parallel>, #tpu.dimension_semantics<arbitrary>], iteration_bounds = array<i64: 2, 1>, scalar_prefetch = 0 : i64, scratch_operands = 0 : i64, tpu.core_type = #tpu.core_type<tc>, window_params = [{transform_indices = @transform_0, window_bounds = array<i64: 1, 8, 128>}, {pipeline_mode = #tpu.pipeline_mode<synchronous>, transform_indices = @transform_1, window_bounds = array<i64: 1, 128, 96>}, {pipeline_mode = #tpu.pipeline_mode<synchronous>, transform_indices = @transform_2, window_bounds = array<i64: 1, 1, 96>}, {pipeline_mode = #tpu.pipeline_mode<synchronous>, transform_indices = @transform_3, window_bounds = array<i64: 1, 32, 128>}, {pipeline_mode = #tpu.pipeline_mode<synchronous>, transform_indices = @transform_4, window_bounds = array<i64: 1, 128>}, {transform_indices = @transform_5, window_bounds = array<i64: 1, 8, 128>}]} {
    %c0 = arith.constant 0 : index
    %c0_0 = arith.constant 0 : index
    %c0_1 = arith.constant 0 : index
    %0 = vector.load %arg2[%c0, %c0_0, %c0_1] : memref<1x8x128xbf16, #tpu.memory_space<vmem>>, vector<1x8x128xbf16>
    %1 = vector.shape_cast %0 : vector<1x8x128xbf16> to vector<8x128xbf16>
    %2 = arith.index_cast %arg1 : i32 to index
    %c0_2 = arith.constant 0 : index
    %c0_3 = arith.constant 0 : index
    %3 = vector.load %arg3[%2, %c0_2, %c0_3] : memref<1x128x96xbf16, #tpu.memory_space<vmem>>, vector<1x128x96xbf16>
    %4 = vector.shape_cast %3 : vector<1x128x96xbf16> to vector<128x96xbf16>
    %cst = arith.constant dense<0.000000e+00> : vector<8x96xf32>
    %5 = tpu.matmul %1, %4, %cst {dimension_numbers = #tpu.dot_dimension_numbers<[1], [0], [0], [1], [0, 0, 1, 1], [], []>} : vector<8x128xbf16>, vector<128x96xbf16>, vector<8x96xf32> -> vector<8x96xf32>
    %6 = arith.index_cast %arg1 : i32 to index
    %c0_4 = arith.constant 0 : index
    %c0_5 = arith.constant 0 : index
    %7 = vector.load %arg4[%6, %c0_4, %c0_5] : memref<1x1x96xf32, #tpu.memory_space<vmem>>, vector<1x1x96xf32>
    %8 = vector.shape_cast %7 : vector<1x1x96xf32> to vector<1x96xf32>
    %9 = vector.broadcast %8 : vector<1x96xf32> to vector<8x96xf32>
    %10 = arith.addf %5, %9 : vector<8x96xf32>
    %11 = vector.extract_strided_slice %10 {offsets = [0, 0], sizes = [8, 8], strides = [1, 1]} : vector<8x96xf32> to vector<8x8xf32>
    %12 = vector.extract_strided_slice %10 {offsets = [0, 32], sizes = [8, 8], strides = [1, 1]} : vector<8x96xf32> to vector<8x8xf32>
    %13 = vector.extract_strided_slice %10 {offsets = [0, 64], sizes = [8, 8], strides = [1, 1]} : vector<8x96xf32> to vector<8x8xf32>
    %14 = arith.truncf %11 : vector<8x8xf32> to vector<8x8xbf16>
    %15 = arith.truncf %12 : vector<8x8xf32> to vector<8x8xbf16>
    %cst_6 = arith.constant dense<0.000000e+00> : vector<8x8xf32>
    %16 = tpu.matmul %14, %15, %cst_6 {dimension_numbers = #tpu.dot_dimension_numbers<[1], [1], [0], [0], [0, 0, 1, 0], [], []>} : vector<8x8xbf16>, vector<8x8xbf16>, vector<8x8xf32> -> vector<8x8xf32>
    %cst_7 = arith.constant dense<0xFF800000> : vector<8xf32>
    %17 = vector.multi_reduction <maximumf>, %16, %cst_7 [1] : vector<8x8xf32> to vector<8xf32>
    %18 = vector.shape_cast %17 : vector<8xf32> to vector<8x1xf32>
    %19 = vector.broadcast %18 : vector<8x1xf32> to vector<8x8xf32>
    %20 = arith.subf %16, %19 : vector<8x8xf32>
    %21 = math.exp %20 : vector<8x8xf32>
    %cst_8 = arith.constant dense<0.000000e+00> : vector<8xf32>
    %22 = vector.multi_reduction <add>, %21, %cst_8 [1] : vector<8x8xf32> to vector<8xf32>
    %23 = vector.shape_cast %22 : vector<8xf32> to vector<8x1xf32>
    %24 = tpu.reciprocal %23 {approx = true} : vector<8x1xf32> -> vector<8x1xf32>
    %25 = vector.broadcast %24 : vector<8x1xf32> to vector<8x8xf32>
    %26 = arith.mulf %21, %25 : vector<8x8xf32>
    %27 = arith.truncf %26 : vector<8x8xf32> to vector<8x8xbf16>
    %28 = arith.truncf %13 : vector<8x8xf32> to vector<8x8xbf16>
    %cst_9 = arith.constant dense<0.000000e+00> : vector<8x8xf32>
    %29 = tpu.matmul %27, %28, %cst_9 {dimension_numbers = #tpu.dot_dimension_numbers<[1], [0], [0], [1], [0, 0, 1, 1], [], []>} : vector<8x8xbf16>, vector<8x8xbf16>, vector<8x8xf32> -> vector<8x8xf32>
    %30 = arith.truncf %29 : vector<8x8xf32> to vector<8x8xbf16>
    %31 = vector.extract_strided_slice %10 {offsets = [0, 8], sizes = [8, 8], strides = [1, 1]} : vector<8x96xf32> to vector<8x8xf32>
    %32 = vector.extract_strided_slice %10 {offsets = [0, 40], sizes = [8, 8], strides = [1, 1]} : vector<8x96xf32> to vector<8x8xf32>
    %33 = vector.extract_strided_slice %10 {offsets = [0, 72], sizes = [8, 8], strides = [1, 1]} : vector<8x96xf32> to vector<8x8xf32>
    %34 = arith.truncf %31 : vector<8x8xf32> to vector<8x8xbf16>
    %35 = arith.truncf %32 : vector<8x8xf32> to vector<8x8xbf16>
    %cst_10 = arith.constant dense<0.000000e+00> : vector<8x8xf32>
    %36 = tpu.matmul %34, %35, %cst_10 {dimension_numbers = #tpu.dot_dimension_numbers<[1], [1], [0], [0], [0, 0, 1, 0], [], []>} : vector<8x8xbf16>, vector<8x8xbf16>, vector<8x8xf32> -> vector<8x8xf32>
    %cst_11 = arith.constant dense<0xFF800000> : vector<8xf32>
    %37 = vector.multi_reduction <maximumf>, %36, %cst_11 [1] : vector<8x8xf32> to vector<8xf32>
    %38 = vector.shape_cast %37 : vector<8xf32> to vector<8x1xf32>
    %39 = vector.broadcast %38 : vector<8x1xf32> to vector<8x8xf32>
    %40 = arith.subf %36, %39 : vector<8x8xf32>
    %41 = math.exp %40 : vector<8x8xf32>
    %cst_12 = arith.constant dense<0.000000e+00> : vector<8xf32>
    %42 = vector.multi_reduction <add>, %41, %cst_12 [1] : vector<8x8xf32> to vector<8xf32>
    %43 = vector.shape_cast %42 : vector<8xf32> to vector<8x1xf32>
    %44 = tpu.reciprocal %43 {approx = true} : vector<8x1xf32> -> vector<8x1xf32>
    %45 = vector.broadcast %44 : vector<8x1xf32> to vector<8x8xf32>
    %46 = arith.mulf %41, %45 : vector<8x8xf32>
    %47 = arith.truncf %46 : vector<8x8xf32> to vector<8x8xbf16>
    %48 = arith.truncf %33 : vector<8x8xf32> to vector<8x8xbf16>
    %cst_13 = arith.constant dense<0.000000e+00> : vector<8x8xf32>
    %49 = tpu.matmul %47, %48, %cst_13 {dimension_numbers = #tpu.dot_dimension_numbers<[1], [0], [0], [1], [0, 0, 1, 1], [], []>} : vector<8x8xbf16>, vector<8x8xbf16>, vector<8x8xf32> -> vector<8x8xf32>
    %50 = arith.truncf %49 : vector<8x8xf32> to vector<8x8xbf16>
    %51 = vector.extract_strided_slice %10 {offsets = [0, 16], sizes = [8, 8], strides = [1, 1]} : vector<8x96xf32> to vector<8x8xf32>
    %52 = vector.extract_strided_slice %10 {offsets = [0, 48], sizes = [8, 8], strides = [1, 1]} : vector<8x96xf32> to vector<8x8xf32>
    %53 = vector.extract_strided_slice %10 {offsets = [0, 80], sizes = [8, 8], strides = [1, 1]} : vector<8x96xf32> to vector<8x8xf32>
    %54 = arith.truncf %51 : vector<8x8xf32> to vector<8x8xbf16>
    %55 = arith.truncf %52 : vector<8x8xf32> to vector<8x8xbf16>
    %cst_14 = arith.constant dense<0.000000e+00> : vector<8x8xf32>
    %56 = tpu.matmul %54, %55, %cst_14 {dimension_numbers = #tpu.dot_dimension_numbers<[1], [1], [0], [0], [0, 0, 1, 0], [], []>} : vector<8x8xbf16>, vector<8x8xbf16>, vector<8x8xf32> -> vector<8x8xf32>
    %cst_15 = arith.constant dense<0xFF800000> : vector<8xf32>
    %57 = vector.multi_reduction <maximumf>, %56, %cst_15 [1] : vector<8x8xf32> to vector<8xf32>
    %58 = vector.shape_cast %57 : vector<8xf32> to vector<8x1xf32>
    %59 = vector.broadcast %58 : vector<8x1xf32> to vector<8x8xf32>
    %60 = arith.subf %56, %59 : vector<8x8xf32>
    %61 = math.exp %60 : vector<8x8xf32>
    %cst_16 = arith.constant dense<0.000000e+00> : vector<8xf32>
    %62 = vector.multi_reduction <add>, %61, %cst_16 [1] : vector<8x8xf32> to vector<8xf32>
    %63 = vector.shape_cast %62 : vector<8xf32> to vector<8x1xf32>
    %64 = tpu.reciprocal %63 {approx = true} : vector<8x1xf32> -> vector<8x1xf32>
    %65 = vector.broadcast %64 : vector<8x1xf32> to vector<8x8xf32>
    %66 = arith.mulf %61, %65 : vector<8x8xf32>
    %67 = arith.truncf %66 : vector<8x8xf32> to vector<8x8xbf16>
    %68 = arith.truncf %53 : vector<8x8xf32> to vector<8x8xbf16>
    %cst_17 = arith.constant dense<0.000000e+00> : vector<8x8xf32>
    %69 = tpu.matmul %67, %68, %cst_17 {dimension_numbers = #tpu.dot_dimension_numbers<[1], [0], [0], [1], [0, 0, 1, 1], [], []>} : vector<8x8xbf16>, vector<8x8xbf16>, vector<8x8xf32> -> vector<8x8xf32>
    %70 = arith.truncf %69 : vector<8x8xf32> to vector<8x8xbf16>
    %71 = vector.extract_strided_slice %10 {offsets = [0, 24], sizes = [8, 8], strides = [1, 1]} : vector<8x96xf32> to vector<8x8xf32>
    %72 = vector.extract_strided_slice %10 {offsets = [0, 56], sizes = [8, 8], strides = [1, 1]} : vector<8x96xf32> to vector<8x8xf32>
    %73 = vector.extract_strided_slice %10 {offsets = [0, 88], sizes = [8, 8], strides = [1, 1]} : vector<8x96xf32> to vector<8x8xf32>
    %74 = arith.truncf %71 : vector<8x8xf32> to vector<8x8xbf16>
    %75 = arith.truncf %72 : vector<8x8xf32> to vector<8x8xbf16>
    %cst_18 = arith.constant dense<0.000000e+00> : vector<8x8xf32>
    %76 = tpu.matmul %74, %75, %cst_18 {dimension_numbers = #tpu.dot_dimension_numbers<[1], [1], [0], [0], [0, 0, 1, 0], [], []>} : vector<8x8xbf16>, vector<8x8xbf16>, vector<8x8xf32> -> vector<8x8xf32>
    %cst_19 = arith.constant dense<0xFF800000> : vector<8xf32>
    %77 = vector.multi_reduction <maximumf>, %76, %cst_19 [1] : vector<8x8xf32> to vector<8xf32>
    %78 = vector.shape_cast %77 : vector<8xf32> to vector<8x1xf32>
    %79 = vector.broadcast %78 : vector<8x1xf32> to vector<8x8xf32>
    %80 = arith.subf %76, %79 : vector<8x8xf32>
    %81 = math.exp %80 : vector<8x8xf32>
    %cst_20 = arith.constant dense<0.000000e+00> : vector<8xf32>
    %82 = vector.multi_reduction <add>, %81, %cst_20 [1] : vector<8x8xf32> to vector<8xf32>
    %83 = vector.shape_cast %82 : vector<8xf32> to vector<8x1xf32>
    %84 = tpu.reciprocal %83 {approx = true} : vector<8x1xf32> -> vector<8x1xf32>
    %85 = vector.broadcast %84 : vector<8x1xf32> to vector<8x8xf32>
    %86 = arith.mulf %81, %85 : vector<8x8xf32>
    %87 = arith.truncf %86 : vector<8x8xf32> to vector<8x8xbf16>
    %88 = arith.truncf %73 : vector<8x8xf32> to vector<8x8xbf16>
    %cst_21 = arith.constant dense<0.000000e+00> : vector<8x8xf32>
    %89 = tpu.matmul %87, %88, %cst_21 {dimension_numbers = #tpu.dot_dimension_numbers<[1], [0], [0], [1], [0, 0, 1, 1], [], []>} : vector<8x8xbf16>, vector<8x8xbf16>, vector<8x8xf32> -> vector<8x8xf32>
    %90 = arith.truncf %89 : vector<8x8xf32> to vector<8x8xbf16>
    %91 = tpu.concatenate %30, %50, %70, %90 in 1 : vector<8x8xbf16>, vector<8x8xbf16>, vector<8x8xbf16>, vector<8x8xbf16> -> vector<8x32xbf16>
    %92 = arith.index_cast %arg1 : i32 to index
    %c0_22 = arith.constant 0 : index
    %c0_23 = arith.constant 0 : index
    %93 = vector.load %arg5[%92, %c0_22, %c0_23] : memref<1x32x128xbf16, #tpu.memory_space<vmem>>, vector<1x32x128xbf16>
    %94 = vector.shape_cast %93 : vector<1x32x128xbf16> to vector<32x128xbf16>
    %cst_24 = arith.constant dense<0.000000e+00> : vector<8x128xf32>
    %95 = tpu.matmul %91, %94, %cst_24 {dimension_numbers = #tpu.dot_dimension_numbers<[1], [0], [0], [1], [0, 0, 1, 1], [], []>} : vector<8x32xbf16>, vector<32x128xbf16>, vector<8x128xf32> -> vector<8x128xf32>
    %c0_i32 = arith.constant 0 : i32
    %96 = arith.cmpi eq, %arg1, %c0_i32 : i32
    %97 = arith.extui %96 : i1 to i32
    %c0_i32_25 = arith.constant 0 : i32
    %98 = arith.cmpi ne, %97, %c0_i32_25 : i32
    scf.if %98 {
      %c0_32 = arith.constant 0 : index
      %c0_33 = arith.constant 0 : index
      %105 = vector.load %arg6[%c0_32, %c0_33] : memref<1x128xf32, #tpu.memory_space<vmem>>, vector<1x128xf32>
      %106 = vector.shape_cast %105 : vector<1x128xf32> to vector<1x128xf32>
      %107 = vector.broadcast %106 : vector<1x128xf32> to vector<8x128xf32>
      %c0_34 = arith.constant 0 : index
      %c0_35 = arith.constant 0 : index
      %c0_36 = arith.constant 0 : index
      %108 = vector.load %arg7[%c0_34, %c0_35, %c0_36] : memref<1x8x128xf32, #tpu.memory_space<vmem>>, vector<1x8x128xf32>
      %109 = vector.shape_cast %108 : vector<1x8x128xf32> to vector<8x128xf32>
      %110 = vector.shape_cast %107 : vector<8x128xf32> to vector<1x8x128xf32>
      tpu.vector_store %arg7[%c0_34, %c0_35, %c0_36], %110 {strides = array<i32>} : memref<1x8x128xf32, #tpu.memory_space<vmem>>, vector<1x8x128xf32>,
    } else {
    }
    %c0_26 = arith.constant 0 : index
    %c0_27 = arith.constant 0 : index
    %c0_28 = arith.constant 0 : index
    %99 = vector.load %arg7[%c0_26, %c0_27, %c0_28] : memref<1x8x128xf32, #tpu.memory_space<vmem>>, vector<1x8x128xf32>
    %100 = vector.shape_cast %99 : vector<1x8x128xf32> to vector<8x128xf32>
    %101 = arith.addf %100, %95 : vector<8x128xf32>
    %c0_29 = arith.constant 0 : index
    %c0_30 = arith.constant 0 : index
    %c0_31 = arith.constant 0 : index
    %102 = vector.load %arg7[%c0_29, %c0_30, %c0_31] : memref<1x8x128xf32, #tpu.memory_space<vmem>>, vector<1x8x128xf32>
    %103 = vector.shape_cast %102 : vector<1x8x128xf32> to vector<8x128xf32>
    %104 = vector.shape_cast %101 : vector<8x128xf32> to vector<1x8x128xf32>
    tpu.vector_store %arg7[%c0_29, %c0_30, %c0_31], %104 {strides = array<i32>} : memref<1x8x128xf32, #tpu.memory_space<vmem>>, vector<1x8x128xf32>,
    return
  }
  func.func @transform_0(%arg0: i32, %arg1: i32) -> (i32, i32, i32) {
    %c0_i32 = arith.constant 0 : i32
    %c0_i32_0 = arith.constant 0 : i32
    %c0_i32_1 = arith.constant 0 : i32
    return %arg0, %c0_i32, %c0_i32_0 : i32, i32, i32
  }
  func.func @transform_1(%arg0: i32, %arg1: i32) -> (i32, i32, i32) {
    %c0_i32 = arith.constant 0 : i32
    %c0_i32_0 = arith.constant 0 : i32
    %c0_i32_1 = arith.constant 0 : i32
    %c0_i32_2 = arith.constant 0 : i32
    return %c0_i32, %c0_i32_0, %c0_i32_1 : i32, i32, i32
  }
  func.func @transform_2(%arg0: i32, %arg1: i32) -> (i32, i32, i32) {
    %c0_i32 = arith.constant 0 : i32
    %c0_i32_0 = arith.constant 0 : i32
    %c0_i32_1 = arith.constant 0 : i32
    %c0_i32_2 = arith.constant 0 : i32
    return %c0_i32, %c0_i32_0, %c0_i32_1 : i32, i32, i32
  }
  func.func @transform_3(%arg0: i32, %arg1: i32) -> (i32, i32, i32) {
    %c0_i32 = arith.constant 0 : i32
    %c0_i32_0 = arith.constant 0 : i32
    %c0_i32_1 = arith.constant 0 : i32
    %c0_i32_2 = arith.constant 0 : i32
    return %c0_i32, %c0_i32_0, %c0_i32_1 : i32, i32, i32
  }
  func.func @transform_4(%arg0: i32, %arg1: i32) -> (i32, i32) {
    %c0_i32 = arith.constant 0 : i32
    %c0_i32_0 = arith.constant 0 : i32
    %c0_i32_1 = arith.constant 0 : i32
    return %c0_i32, %c0_i32_0 : i32, i32
  }
  func.func @transform_5(%arg0: i32, %arg1: i32) -> (i32, i32, i32) {
    %c0_i32 = arith.constant 0 : i32
    %c0_i32_0 = arith.constant 0 : i32
    %c0_i32_1 = arith.constant 0 : i32
    return %arg0, %c0_i32, %c0_i32_0 : i32, i32, i32
  }
}

</mosaic_0001>

<bundles_post_ra>
// kernel: tpu_custom_call.1
= control target key start
LH: loop header
LB: loop body
LE: loop exit
PB: predicated region body
PF: predicated region fallthrough
CT: control target
= control target key end

     0   :  { %10 = vsyncpa [#allocation3], 0  ;;  %s1165_s0 = inlined_call_operand.vmem [shape: bf16[2,8,128], index: 0, kind: input, shape index: {}]   ;;  %s1166_s1 = inlined_call_operand.vmem [shape: bf16[1,128,96], index: 1, kind: input, shape index: {}]   ;;  %s1167_s2 = inlined_call_operand.vmem [shape: f32[1,1,96], index: 2, kind: input, shape index: {}]   ;;  %s1168_s3 = inlined_call_operand.vmem [shape: bf16[1,32,128], index: 3, kind: input, shape index: {}]   ;;  %s1169_s4 = inlined_call_operand.vmem [shape: f32[1,128], index: 4, kind: input, shape index: {}]   ;;  %s1170_s5 = inlined_call_operand.hbm [shape: f32[2,8,128], index: 5, kind: output, shape index: {}]  }
   0x1   :  { %12 = vsyncpa [#allocation3 + $0x1], 0  ;;  %s989_s18 = smov 0   ;;  %s991_s19 = smov 0  }
   0x2   :  { %s993_s20 = smov 0   ;;  %s995_s21 = smov 0  }
   0x3   :  { %s997_s22 = smov 0   ;;  %s999_s23 = smov 0  }
   0x4 LB: > { %s708_s24 = sadd.s32 4294967295, %s943_s23   ;;  %s709_s25 = sadd.s32 4294967294, %s943_s23   ;;  %s943_s23 = sphi %s999_s23, %s18_s23   ;;  %s939_s22 = sphi %s997_s22, %s1177_s22   ;;  %s935_s21 = sphi %s995_s21, %s1176_s21   ;;  %s931_s20 = sphi %s993_s20, %s1175_s20   ;;  %s927_s19 = sphi %s991_s19, %s1174_s19   ;;  %s923_s18 = sphi %s989_s18, %s1173_s18  }
   0x5   : > { %s30_s26 = sadd.s32 1, %s939_s22  ;;  %s147_s27 = sadd.s32 1, %s931_s20 }
   0x6   : > { %p32_p0 = scmp.ge.s32.totalorder %s30_s26, 2  ;;  %p157_p1 = scmp.ne.s32.totalorder %s931_s20, %s927_s19 }
   0x7   : > { %p158_p2 = scmp.eq.s32.totalorder %s708_s24, 1  ;;  %p163_p3 = scmp.ne.s32.totalorder %s927_s19, %s923_s18 }
   0x8   : > { %s1179_s26 = smov (%p32_p0, %s30_s26), 0  ;;  %p164_p5 = scmp.eq.s32.totalorder %s709_s25, 1 }
   0x9   : > { %p1029_p4 = por %p158_p2, %p157_p1  ;;  %s144_s29 = ssub.s32 %s939_s22, %s1179_s26 }
   0xa   : > { %p712_p6 = scmp.ge.s32.totalorder %s943_s23, 1  ;;  %p145_p7 = scmp.eq.s32.totalorder %s144_s29, 0 }
   0xb   : > { %p1036_p8 = por %p164_p5, %p163_p3  ;;  %p201_p9 = scmp.lt.s32.totalorder %s943_s23, 3 }
   0xc   : > { %s1042_s6 = scalar_select %p145_p7, %s931_s20, %s147_s27  }
   0xd   : > { %p202_p10 = pnand %p712_p6, %p201_p9 }
   0xe   : > { %p228_p11 = scmp.lt.s32.totalorder (!%p202_p10), %s935_s21, 1  ;;  %s945_s15 = smov (!%p202_p10), 120  }
   0xf   : > { %205 = sbr.rel (%p202_p10) target bundleno = 1519 (0x5ef), region = 40  ;;  %s946_s16 = smov (!%p202_p10), 96  }
  0x10   : > { %s947_s17 = smov (!%p202_p10), 88   ;;  %s948_s24 = smov (!%p202_p10), 64  }
  0x11   : > { %s950_s27 = smov (!%p202_p10), 72   ;;  %s951_s29 = smov (!%p202_p10), 112  }
  0x12   : > { %s953_s8 = smov (!%p202_p10), 80   ;;  %s954_s9 = smov (!%p202_p10), 40  }
  0x13   : > { %s955_s10 = smov (!%p202_p10), 48   ;;  %s956_s11 = smov (!%p202_p10), 8  }
  0x14   : > { %v775_v0 = vld [vmem:[%s1166_s1 + $0x38] sm:$0xff]  ;;  %v774_v1 = vld [vmem:[%s1166_s1 + $0x30] sm:$0xff]  ;;  %v773_v2 = vld [vmem:[%s1166_s1 + $0x28] sm:$0xff]  ;;  %s229_s25 = scalar_select %p228_p11, %s935_s21, 1  ;;  %vm323_vm0 = vcmask 64512   ;;  %vm360_vm1 = vcmask 1043456  }
  0x15   : > { %306 = vmatpush.bf16.msra.mxu0 %v775_v0  ;;  %v772_v3 = vld [vmem:[%s1166_s1 + $0x20] sm:$0xff]  ;;  %v771_v4 = vld [vmem:[%s1166_s1 + $0x18] sm:$0xff]  ;;  %v770_v5 = vld [vmem:[%s1166_s1 + $0x10] sm:$0xff]  ;;  %s958_s13 = smov 16   ;;  %vm567_vm2 = vcmask 130048   ;;  %vm570_vm3 = vcmask 195584  }
  0x16   : > { %v769_v6 = vld [vmem:[%s1166_s1 + $0x8] sm:$0xff]  ;;  %s714_s7 = sshll.u32 %s229_s25, 2  ;;  %v768_v7 = vld [vmem:[%s1166_s1] sm:$0xff]  ;;  %s949_s25 = smov 56   ;;  %vm592_vm4 = vcmask 261120  }
  0x17   : > { %s231_s12 = scalar_lea.vmem %s1165_s0, %s714_s7  ;;  %v847_v9 = vld [vmem:[%s1167_s2] ss:$0 sm:$0xff]  ;;  %s952_s7 = smov 104  }
  0x18   : > { %v233_v8 = vld [vmem:[%s231_s12] sm:$0xf]  ;;  %s957_s12 = smov 24  }
  0x19   : > { %307 = vmatpush.bf16.msra.mxu0 %v774_v1 }
  0x1d   : > { %308 = vmatpush.bf16.msra.mxu0 %v773_v2 }
  0x21   : > { %309 = vmatpush.bf16.msra.mxu0 %v772_v3 }
  0x25   : > { %310 = vmatpush.bf16.msra.mxu0 %v771_v4 }
  0x29   : > { %311 = vmatpush.bf16.msra.mxu0 %v770_v5 }
  0x2d   : > { %312 = vmatpush.bf16.msra.mxu0 %v769_v6 }
  0x31   : > { %313 = vmatpush.bf16.msra.mxu0 %v768_v7 }
  0x34   : > { %314 = vmatmul.bf16.vlgmr.msra.gmra.mxu0 %v233_v8 }
  0xb1   : > { %v315_v10 = vpop.f32.mrf.mxu0 }
  0xb2   : > { %v316_v11 = vadd.f32 %v847_v9, %v315_v10 }
  0xb4   : > { %v1076_v12 = vpack.c.bf16 %v316_v11, %v316_v11 }
  0xb6   : > { %378 = vrot.lane.b32.xlu1 %v1076_v12, %s945_s15  ;;  %321 = vrot.lane.b32.xlu0 %v1076_v12, %s946_s16 }
  0xb9   : > { %v317_v13 = vpop.f32.mrf.mxu0 }
  0xbe   : > { %380 = vrot.lane.b32.xlu0 %v1076_v12, %s947_s17 }
  0xc6   : > { %355 = vrot.lane.b32.xlu0 %v1076_v12, %s948_s24  ;;  %s225_s24 = sand.u32 1, %s927_s19  }
  0xc7   : > { %s621_s14 = scalar_lea.sflag [#allocation3], %s225_s24 }
  0xce   : > { %413 = vrot.lane.b32.xlu0 %v1076_v12, %s949_s25  ;;  %s765_s25 = sshll.u32 %s935_s21, 3 }
  0xd6   : > { %494 = vrot.lane.b32.xlu0 %v1076_v12, %s950_s27  ;;  %s713_s27 = sshll.u32 %s225_s24, 3 }
  0xde   : > { %435 = vrot.lane.b32.xlu0 %v1076_v12, %s951_s29 }
  0xe6   : > { %492 = vrot.lane.b32.xlu0 %v1076_v12, %s952_s7 }
 0x128   : > { %v322_v14 = vpop.permute.xlu0 %321  ;;  %v379_v18 = vpop.permute.xlu1 %378 }
 0x129   : > { %v328_v15 = vsel %vm323_vm0, %v322_v14, 0 }
 0x12a   : > { %337 = vmatpush.bf16.xpose.msra.mxu1 %v328_v15 }
 0x130   : > { %v381_v16 = vpop.permute.xlu0 %380 }
 0x131   : > { %747 = vmatmul.msk.bf16.vlgmr.msra.gmra.mxu1 %vm323_vm0, %v1076_v12  ;;  %v386_v17 = vsel %vm323_vm0, %v381_v16, 0 }
 0x132   : > { %395 = vmatpush.bf16.xpose.msra.mxu3 %v386_v17 }
 0x138   : > { %v356_v19 = vpop.permute.xlu0 %355 }
 0x139   : > { %749 = vmatmul.msk.bf16.vlgmr.msra.gmra.mxu3 %vm323_vm0, %v379_v18  ;;  %v362_v20 = vsel %vm360_vm1, %v356_v19, 0 }
 0x13a   : > { %371 = vmatpush.bf16.msra.mxu2 %v362_v20 }
 0x140   : > { %v414_v21 = vpop.permute.xlu0 %413 }
 0x141   : > { %v419_v22 = vsel %vm360_vm1, %v414_v21, 0 }
 0x142   : > { %428 = vmatpush.bf16.msrb.mxu2 %v419_v22 }
 0x148   : > { %v495_v42 = vpop.permute.xlu0 %494 }
 0x149   : > { %v500_v44 = vsel %vm323_vm0, %v495_v42, 0 }
 0x150   : > { %v436_v51 = vpop.permute.xlu0 %435 }
 0x158   : > { %v493_v52 = vpop.permute.xlu0 %492 }
 0x1ae   : > { %v339_v23 = vpop.f32.mrf.mxu1 }
 0x1af   : > { %v343_v24 = vsel %vm323_vm0, %v339_v23, -inf }
 0x1b0   : > { %344 = vmax.xlane.f32.xlu1 %v343_v24 }
 0x1b6   : > { %v341_v25 = vpop.f32.mrf.mxu1 }
 0x1bc   : > { %v397_v26 = vpop.f32.mrf.mxu3 }
 0x1bd   : > { %v401_v27 = vsel %vm323_vm0, %v397_v26, -inf }
 0x1be   : > { %402 = vmax.xlane.f32.xlu2 %v401_v27 }
 0x1c4   : > { %v399_v28 = vpop.f32.mrf.mxu3 }
 0x223   : > { %v345_v29 = vpop.xlane.xlu1 %344 }
 0x224   : > { %v346_v30 = vsub.f32 %v339_v23, %v345_v29 }
 0x226   : > { %v347_v31 = vmul.f32 1.442695, %v346_v30 }
 0x228   : > { %849 = vpow2.f32 %v347_v31 }
 0x22e   : > { %v850_v32 = vpop.eup %849 }
 0x22f   : > { %v349_v33 = vsel %vm323_vm0, %v850_v32, 0.0 }
 0x230   : > { %350 = vadd.xlane.f32.xlu2 %v349_v33 }
 0x231   : > { %v403_v34 = vpop.xlane.xlu2 %402 }
 0x232   : > { %v404_v35 = vsub.f32 %v397_v26, %v403_v34  ;;  %v777_v34 = vld [vmem:[%s1168_s3 + $0x8] sm:$0xff] }
 0x234   : > { %v405_v36 = vmul.f32 1.442695, %v404_v35  ;;  %v776_v35 = vld [vmem:[%s1168_s3] sm:$0xff] }
 0x236   : > { %851 = vpow2.f32 %v405_v36 }
 0x23c   : > { %v852_v37 = vpop.eup %851 }
 0x23d   : > { %v407_v38 = vsel %vm323_vm0, %v852_v37, 0.0 }
 0x23e   : > { %408 = vadd.xlane.f32.xlu2 %v407_v38 }
 0x256   : > { %437 = vrot.lane.b32.xlu2 %v1076_v12, %s953_s8  ;;  %s631_s8 = scalar_lea.hbm %s1170_s5, %s765_s25  ;;  %s885_s25 = scalar_lea.hbm %s1170_s5, 16 }
 0x2a3   : > { %v351_v39 = vpop.xlane.xlu2 %350 }
 0x2a4   : > { %853 = vrcp.f32 %v351_v39 }
 0x2aa   : > { %v854_v40 = vpop.eup %853 }
 0x2ab   : > { %v353_v41 = vmul.f32 %v854_v40, %v850_v32 }
 0x2ad   : > { %v354_v43 = vpack.c.bf16 %v353_v41, %v353_v41 }
 0x2af   : > { %748 = vmatmul.msk.bf16.vlgmr.msra.gmra.mxu2 %vm323_vm0, %v354_v43  ;;  %v848_v43 = vld [vmem:[%s1169_s4] ss:$0 sm:$0xff] }
 0x2b0   : > { %509 = vmatpush.bf16.xpose.msra.mxu2 %v500_v44 }
 0x2b1   : > { %v409_v45 = vpop.xlane.xlu2 %408 }
 0x2b2   : > { %855 = vrcp.f32 %v409_v45 }
 0x2b8   : > { %v856_v46 = vpop.eup %855 }
 0x2b9   : > { %v411_v47 = vmul.f32 %v856_v46, %v852_v37  ;;  %v438_v48 = vpop.permute.xlu2 %437 }
 0x2ba   : > { %v443_v49 = vsel %vm323_vm0, %v438_v48, 0 }
 0x2bb   : > { %452 = vmatpush.bf16.xpose.msrb.mxu1 %v443_v49  ;;  %v412_v50 = vpack.c.bf16 %v411_v47, %v411_v47 }
 0x2bf   : > { %750 = vmatmul.msk.bf16.vlgmr.msrb.gmra.mxu2 %vm323_vm0, %v412_v50 }
 0x2c2   : > { %751 = vmatmul.msk.bf16.vlgmr.msrb.gmra.mxu1 %vm323_vm0, %v436_v51 }
 0x2cf   : > { %753 = vmatmul.msk.bf16.vlgmr.msra.gmra.mxu2 %vm323_vm0, %v493_v52 }
 0x332   : > { %v1104_v53 = vpop.f32.mrf.mxu2 }
 0x333   : > { %v377_v37 = vpack.c.bf16 %v1104_v53, %v1104_v53 }
 0x33a   : > { %v375_v54 = vpop.f32.mrf.mxu2 }
 0x33f   : > { %v454_v55 = vpop.f32.mrf.mxu1 }
 0x340   : > { %v458_v56 = vsel %vm323_vm0, %v454_v55, -inf }
 0x341   : > { %459 = vmax.xlane.f32.xlu2 %v458_v56 }
 0x342   : > { %v430_v57 = vpop.f32.mrf.mxu2 }
 0x343   : > { %v434_v11 = vpack.c.bf16 %v430_v57, %v430_v57 }
 0x345   : > { %v550_v13 = vunpack.c.l.b16 %v434_v11 }
 0x347   : > { %v456_v58 = vpop.f32.mrf.mxu1  ;;  %v551_v14 = vpack.c.b16 %v550_v13, %v550_v13 }
 0x34a   : > { %v432_v59 = vpop.f32.mrf.mxu2 }
 0x352   : > { %v511_v60 = vpop.f32.mrf.mxu2 }
 0x353   : > { %v515_v61 = vsel %vm323_vm0, %v511_v60, -inf }
 0x354   : > { %516 = vmax.xlane.f32.xlu1 %v515_v61 }
 0x359   : > { %527 = vrot.lane.b32.xlu2 %v1076_v12, %s954_s9 }
 0x35a   : > { %v513_v62 = vpop.f32.mrf.mxu2 }
 0x3b4   : > { %v460_v63 = vpop.xlane.xlu2 %459 }
 0x3b5   : > { %v461_v0 = vsub.f32 %v454_v55, %v460_v63 }
 0x3b7   : > { %v462_v1 = vmul.f32 1.442695, %v461_v0 }
 0x3b9   : > { %857 = vpow2.f32 %v462_v1 }
 0x3bc   : > { %v528_v2 = vpop.permute.xlu2 %527 }
 0x3bd   : > { %v533_v3 = vsel %vm360_vm1, %v528_v2, 0 }
 0x3be   : > { %542 = vmatpush.bf16.msra.mxu1 %v533_v3 }
 0x3bf   : > { %v858_v4 = vpop.eup %857 }
 0x3c0   : > { %v464_v5 = vsel %vm323_vm0, %v858_v4, 0.0 }
 0x3c1   : > { %465 = vadd.xlane.f32.xlu0 %v464_v5 }
 0x3c7   : > { %v517_v6 = vpop.xlane.xlu1 %516 }
 0x3c8   : > { %v518_v7 = vsub.f32 %v511_v60, %v517_v6 }
 0x3ca   : > { %v519_v8 = vmul.f32 1.442695, %v518_v7 }
 0x3cc   : > { %859 = vpow2.f32 %v519_v8 }
 0x3d2   : > { %v860_v9 = vpop.eup %859 }
 0x3d3   : > { %v521_v10 = vsel %vm323_vm0, %v860_v9, 0.0 }
 0x3d4   : > { %522 = vadd.xlane.f32.xlu1 %v521_v10 }
 0x3ed   : > { %470 = vrot.lane.b32.xlu1 %v1076_v12, %s955_s10 }
 0x3f5   : > { %552 = vrot.lane.b32.xlu1 %v551_v14, %s956_s11  ;;  %s227_s11 = scalar_lea.vmem [#allocation2], %s713_s27 }
 0x434   : > { %v466_v19 = vpop.xlane.xlu0 %465 }
 0x447   : > { %v523_v15 = vpop.xlane.xlu1 %522 }
 0x448   : > { %861 = vrcp.f32 %v523_v15 }
 0x449   : > { %863 = vrcp.f32 %v466_v19 }
 0x44e   : > { %v862_v16 = vpop.eup %861 }
 0x44f   : > { %v525_v17 = vmul.f32 %v862_v16, %v860_v9  ;;  %v864_v20 = vpop.eup %863 }
 0x450   : > { %v468_v21 = vmul.f32 %v864_v20, %v858_v4 }
 0x451   : > { %v526_v18 = vpack.c.bf16 %v525_v17, %v525_v17 }
 0x452   : > { %v469_v12 = vpack.c.bf16 %v468_v21, %v468_v21 }
 0x453   : > { %754 = vmatmul.msk.bf16.vlgmr.msra.gmra.mxu1 %vm323_vm0, %v526_v18 }
 0x45f   : > { %v471_v22 = vpop.permute.xlu1 %470 }
 0x460   : > { %v476_v23 = vsel %vm360_vm1, %v471_v22, 0 }
 0x461   : > { %485 = vmatpush.bf16.msrb.mxu3 %v476_v23 }
 0x464   : > { %752 = vmatmul.msk.bf16.vlgmr.msrb.gmra.mxu3 %vm323_vm0, %v469_v12 }
 0x465   : > { %601 = vmatpush.bf16.msra.mxu3 %v777_v34 }
 0x467   : > { %v553_v36 = vpop.permute.xlu1 %552 }
 0x468   : > { %v566_v38 = vsel %vm323_vm0, %v377_v37, %v553_v36 }
 0x469   : > { %602 = vmatpush.bf16.msra.mxu3 %v776_v35 }
 0x4d0   : > { %v544_v24 = vpop.f32.mrf.mxu1 }
 0x4d1   : > { %v548_v25 = vpack.c.bf16 %v544_v24, %v544_v24 }
 0x4d3   : > { %v560_v26 = vunpack.c.l.b16 %v548_v25 }
 0x4d5   : > { %v561_v27 = vpack.c.b16 %v560_v26, %v560_v26 }
 0x4d7   : > { %562 = vrot.lane.b32.xlu1 %v561_v27, %s957_s12  ;;  %s633_s12 = sshll.u32 %s227_s11, 4  ;;  %s634_s12 = int_to_ptr.vmem [resolvable:$true] %s633_s12 }
 0x4d8   : > { %v546_v28 = vpop.f32.mrf.mxu1 }
 0x4e7   : > { %v487_v29 = vpop.f32.mrf.mxu3 }
 0x4e8   : > { %v491_v30 = vpack.c.bf16 %v487_v29, %v487_v29 }
 0x4ea   : > { %v555_v31 = vunpack.c.l.b16 %v491_v30 }
 0x4ec   : > { %v556_v32 = vpack.c.b16 %v555_v31, %v555_v31 }
 0x4ee   : > { %557 = vrot.lane.b32.xlu0 %v556_v32, %s958_s13  ;;  %s635_s13 = sshll.u32 %s631_s8, 4  ;;  %s636_s13 = int_to_ptr.hbm [resolvable:$true] %s635_s13 }
 0x4ef   : > { %v489_v33 = vpop.f32.mrf.mxu3  ;;  %s879_s21 = sshra.s32 %s636_s13, 4  ;;  %s880_s21 = int_to_ptr.hbm [resolvable:$true] %s879_s21 }
 0x4f0   : > { %s881_s15 = scalar_lea.hbm %s880_s21, 8  ;;  %p886_p1 = scmp.lt.s32.totalorder %s880_s21, %s1170_s5 }
 0x4f1   : > { %p882_p12 = scmp.ne.s32.totalorder %s880_s21, %s881_s15  ;;  %p887_p2 = scmp.lt.s32.totalorder %s885_s25, %s881_s15 }
 0x4f3   : > { %p883_p13 = pnand %p882_p12, %p1029_p4  ;;  %p888_p3 = por %p887_p2, %p886_p1 }
 0x4f5   : > { %p884_p0 = pneg %p883_p13 }
 0x4f7   : > { %p889_p5 = pnand %p888_p3, %p884_p0 }
 0x549   : > { %v563_v40 = vpop.permute.xlu1 %562 }
 0x560   : > { %v558_v39 = vpop.permute.xlu0 %557 }
 0x561   : > { %v569_v41 = vsel %vm567_vm2, %v566_v38, %v558_v39 }
 0x562   : > { %v572_v42 = vsel %vm570_vm3, %v569_v41, %v563_v40 }
 0x563   : > { %763 = vmatmul.msk.bf16.vlgmr.msra.gmra.mxu3 %vm592_vm4, %v572_v42 }
 0x5e6   : > { %v604_v44 = vpop.f32.mrf.mxu3 }
 0x5e7   : > { %v618_v45 = vadd.f32 %v848_v43, %v604_v44 }
 0x5e9   : > { %619 = vst [vmem:[%s227_s11] sm:$0xff] %v618_v45 }
 0x5ea   : > { %892 = shalt.err (!%p889_p5)
}
 0x5eb   : > { %778 = dma.vmem_to_hbm [thread:$0]  (%p1029_p4), %s634_s12, 128, %s636_s13, %s621_s14  }
 0x5ee   : > { %v606_v46 = vpop.f32.mrf.mxu3 }
 0x5ef PF: > { %p784_p6 = scmp.ge.s32.totalorder %s943_s23, 2  ;;  %s647_s24 = sand.u32 1, %s923_s18  }
 0x5f0   : > { %s648_s7 = scalar_lea.sflag [#allocation3], %s647_s24 }
 0x5f1   : > { %p781_p7 = pnand %p784_p6, %p1036_p8 }
 0x5f3   : > { %p782_p9 = pneg %p781_p7 }
 0x5f5   : > { %918 = dma.done.wait (%p782_p9), %s648_s7, 128  }
 0x5f6   : > { %920 = vsyncadd (%p782_p9), %s648_s7, 4294967168  ;;  %s18_s23 = sadd.s32 1, %s943_s23   ;;  %s1173_s18 = smov %s927_s19 }
 0x5f7   : > { %p15_p10 = scmp.ge.s32.totalorder %s18_s23, 4   ;;  %s1174_s19 = smov %s931_s20 }
 0x5f8   : > { %s1175_s20 = smov %s1042_s6  ;;  %s1176_s21 = smov %s939_s22 }
 0x5f9   : > { %s1177_s22 = smov %s1179_s26  ;;  %17 = sbr.rel (!%p15_p10) target bundleno = 4 (0x4), region = 82 }
 0x5fe   :  { %654 = vsyncpa [#allocation3], 1 }
 0x5ff   :  { %656 = vsyncpa [#allocation3 + $0x1], 1 }

</bundles_post_ra>
